<compile_context>
chip_gen: v6e
topology: v6e:2x2x1
jax: 0.10.0
libtpu: 0.0.40
codegen_flags: <defaults>
</compile_context>

<pallas_src>
import jax
import jax.numpy as jnp
from jax.experimental import pallas as pl
from jax.experimental.pallas import tpu as pltpu

_MASKING_VALUE = -1e30  # float32 path of the PyTorch module


def _attn_bpp_kernel(bpp_ref, vproj_ref, wo_ref, bo_ref, out_ref):
    # masked_fill(bpp == 0, -1e30) + row softmax on this (TQ, S_pad) tile.
    bpp = bpp_ref[...]                                        # (TQ, S_pad) f32
    scores = jnp.where(bpp == 0.0, _MASKING_VALUE, bpp)
    m = jnp.max(scores, axis=-1, keepdims=True)
    e = jnp.exp(scores - m)
    inv = pl.reciprocal(jnp.sum(e, axis=-1, keepdims=True), approx=True)
    probs = (e * inv).astype(jnp.bfloat16)                    # (TQ, S_pad) bf16

    # Attention + output projection (bf16 operands, f32 accumulate on MXU).
    attn = jnp.dot(probs, vproj_ref[...],
                   preferred_element_type=jnp.float32)         # (TQ, Dp) f32
    out = jnp.dot(attn.astype(jnp.bfloat16), wo_ref[...],
                  preferred_element_type=jnp.float32) + bo_ref[...]
    out_ref[...] = out.astype(out_ref.dtype)


def _round_up(x, m):
    return (x + m - 1) // m * m


def _vmem_budget_bytes():
    """~75% of physical VMEM: ≈48 MiB on v7x (64 MiB/TC), ≈96 MiB on v5e/v6e."""
    try:
        cap = pltpu.get_tpu_info().vmem_capacity_bytes
    except Exception:
        cap = 64 * 1024 * 1024  # conservative fallback (v7x per-TC)
    return (int(cap) * 3) // 4


def _choose_tiling(S, Dp, tq, budget_bytes):
    """Return (tq, S_pad); S is padded up to a multiple of the query tile."""
    if tq is not None:
        tq = min(tq, S)
        if tq < S:
            assert tq % 8 == 0, "explicit query tile must be a multiple of 8"
        return tq, _round_up(S, tq)
    if S <= 512:
        # One query tile per batch element; block dims equal full array dims.
        return S, S
    # VMEM-budgeted tile: bpp + out double-buffered f32 per TQ row, v_proj/W_o
    # single-buffered bf16 resident.  Multiple of 128, capped at 512.
    s_pad0 = _round_up(S, 128)
    fixed = s_pad0 * Dp * 2 + Dp * Dp * 2 + 4 * Dp * 4
    per_tq = 2 * s_pad0 * 4 + 2 * Dp * 4
    tq_fit = max(128, (budget_bytes - fixed) // per_tq)
    tq = max(128, min(512, (tq_fit // 128) * 128))
    return tq, _round_up(S, tq)


def _const_spec(block_shape, index_map):
    """Single-buffer operands whose block index is (nearly) constant."""
    try:
        return pl.BlockSpec(block_shape, index_map, pipeline_mode=pl.Buffered(1))
    except (AttributeError, TypeError):
        return pl.BlockSpec(block_shape, index_map)


def custom_attention_bpp(bpp, V, wv_t, bv, wo_t, bo, *, tq=None):
    """bpp: (B,S,S) f32, V: (B,S,D) f32; weights pre-transposed (in,out); biases (D,).

    TODO(synk): the optional `mask` argument of the PyTorch forward is not
    implemented (mask=None path only).
    """
    B, S, D = V.shape
    assert bpp.shape == (B, S, S)

    # Hoisted V projection (once, plain XLA); shipped to the kernel as bf16.
    v_proj = V @ wv_t + bv                                     # (B, S, D) f32

    # Lane-dense feature axis; budget-derived query tile; pad S to a multiple
    # of the tile.  Padded bpp entries are 0 -> masked to -1e30 -> contribute
    # exactly 0 to the softmax; padded query rows / feature columns are sliced
    # off afterwards (corner case: a real all-zero bpp row would see the
    # padded keys as extra uniformly-weighted positions).
    Dp = _round_up(D, 128)
    budget = _vmem_budget_bytes()
    tq, S_pad = _choose_tiling(S, Dp, tq, budget)

    if Dp != D or S_pad != S:
        v_proj = jnp.pad(v_proj, ((0, 0), (0, S_pad - S), (0, Dp - D)))
        wo_t = jnp.pad(wo_t, ((0, Dp - D), (0, Dp - D)))
        bo = jnp.pad(bo, (0, Dp - D))
        bpp = jnp.pad(bpp, ((0, 0), (0, S_pad - S), (0, S_pad - S)))

    v_proj = v_proj.astype(jnp.bfloat16)
    wo_bf = wo_t.astype(jnp.bfloat16)
    bo2 = bo.reshape(1, Dp).astype(jnp.float32)

    nq = S_pad // tq
    out = pl.pallas_call(
        _attn_bpp_kernel,
        out_shape=jax.ShapeDtypeStruct((B, S_pad, Dp), jnp.float32),
        grid_spec=pltpu.PrefetchScalarGridSpec(
            num_scalar_prefetch=0,
            grid=(B, nq),
            in_specs=[
                # bpp query-row tile (dominant HBM stream), double-buffered.
                pl.BlockSpec((None, tq, S_pad), lambda b, q: (b, q, 0)),
                # Precomputed v_proj for this batch element (bf16), single-buffered.
                _const_spec((None, S_pad, Dp), lambda b, q: (b, 0, 0)),
                _const_spec((Dp, Dp), lambda b, q: (0, 0)),    # W_o^T (bf16)
                _const_spec((1, Dp), lambda b, q: (0, 0)),     # b_o
            ],
            out_specs=pl.BlockSpec((None, tq, Dp), lambda b, q: (b, q, 0)),
        ),
        compiler_params=pltpu.CompilerParams(
            dimension_semantics=("parallel", "parallel"),
            vmem_limit_bytes=budget,
        ),
    )(bpp, v_proj, wo_bf, bo2)

    return out[:, :S, :D]


def _reference(bpp, V, wv_t, bv, wo_t, bo):
    v_proj = V @ wv_t + bv
    scores = jnp.where(bpp == 0.0, _MASKING_VALUE, bpp)
    probs = jax.nn.softmax(scores, axis=-1)
    attn = jnp.einsum("bqk,bkd->bqd", probs, v_proj)
    return attn @ wo_t + bo


if __name__ == "__main__":
    B, S, D = 2, 8, 32          # batch, seq, d_model (num_heads=1 equivalent)
    key = jax.random.PRNGKey(0)
    k1, k2, k3, k4, k5, k6 = jax.random.split(key, 6)

    # bpp with some exact zeros (exercises the masked_fill path)
    bpp_raw = jax.random.uniform(k1, (B, S, S), dtype=jnp.float32)
    bpp = jnp.where(bpp_raw < 0.3, 0.0, bpp_raw)
    V = jax.random.normal(k2, (B, S, D), dtype=jnp.float32)

    # Deterministic Linear params (PyTorch: y = x @ W^T + b); store W^T directly.
    wv_t = jax.random.normal(k3, (D, D), dtype=jnp.float32) * 0.1
    bv = jax.random.normal(k4, (D,), dtype=jnp.float32) * 0.1
    wo_t = jax.random.normal(k5, (D, D), dtype=jnp.float32) * 0.1
    bo = jax.random.normal(k6, (D,), dtype=jnp.float32) * 0.1

    out = custom_attention_bpp(bpp, V, wv_t, bv, wo_t, bo)
    out = jax.block_until_ready(out)
    ref = _reference(bpp, V, wv_t, bv, wo_t, bo)
    assert out.shape == (B, S, D)
    # bf16 MXU operands with f32 accumulation → allow ~1% relative error.
    assert jnp.allclose(out, ref, atol=3e-2, rtol=3e-2), (
        float(jnp.max(jnp.abs(out - ref))))

    # Also exercise the multi-tile grid + S/D padding path with an explicit tile.
    S2 = 24
    bpp2_raw = jax.random.uniform(k1, (B, S2, S2), dtype=jnp.float32)
    bpp2 = jnp.where(bpp2_raw < 0.3, 0.0, bpp2_raw)
    V2 = jax.random.normal(k2, (B, S2, D), dtype=jnp.float32)
    out2 = custom_attention_bpp(bpp2, V2, wv_t, bv, wo_t, bo, tq=16)
    out2 = jax.block_until_ready(out2)
    ref2 = _reference(bpp2, V2, wv_t, bv, wo_t, bo)
    assert out2.shape == (B, S2, D)
    assert jnp.allclose(out2, ref2, atol=3e-2, rtol=3e-2), (
        float(jnp.max(jnp.abs(out2 - ref2))))

    print("KERNEL_OK")
</pallas_src>

<mosaic_0001>
module attributes {stable_mosaic.version = 11 : i64} {
  func.func @_attn_bpp_kernel(%arg0: i32, %arg1: i32, %arg2: memref<1x8x8xf32, #tpu.memory_space<vmem>>, %arg3: memref<1x8x128xbf16, #tpu.memory_space<vmem>>, %arg4: memref<128x128xbf16, #tpu.memory_space<vmem>>, %arg5: memref<1x128xf32, #tpu.memory_space<vmem>>, %arg6: memref<1x8x128xf32, #tpu.memory_space<vmem>>) attributes {dimension_semantics = [#tpu.dimension_semantics<parallel>, #tpu.dimension_semantics<parallel>], iteration_bounds = array<i64: 2, 1>, scalar_prefetch = 0 : i64, scratch_operands = 0 : i64, tpu.core_type = #tpu.core_type<tc>, window_params = [{transform_indices = @transform_0, window_bounds = array<i64: 1, 8, 8>}, {pipeline_mode = #tpu.pipeline_mode<synchronous>, transform_indices = @transform_1, window_bounds = array<i64: 1, 8, 128>}, {pipeline_mode = #tpu.pipeline_mode<synchronous>, transform_indices = @transform_2, window_bounds = array<i64: 128, 128>}, {pipeline_mode = #tpu.pipeline_mode<synchronous>, transform_indices = @transform_3, window_bounds = array<i64: 1, 128>}, {transform_indices = @transform_4, window_bounds = array<i64: 1, 8, 128>}]} {
    %c0 = arith.constant 0 : index
    %c0_0 = arith.constant 0 : index
    %c0_1 = arith.constant 0 : index
    %0 = vector.load %arg2[%c0, %c0_0, %c0_1] : memref<1x8x8xf32, #tpu.memory_space<vmem>>, vector<1x8x8xf32>
    %1 = vector.shape_cast %0 : vector<1x8x8xf32> to vector<8x8xf32>
    %cst = arith.constant 0.000000e+00 : f32
    %2 = vector.broadcast %cst : f32 to vector<8x8xf32>
    %3 = arith.cmpf oeq, %1, %2 : vector<8x8xf32>
    %cst_2 = arith.constant -1.000000e+30 : f32
    %4 = vector.broadcast %cst_2 : f32 to vector<8x8xf32>
    %5 = arith.select %3, %4, %1 : vector<8x8xi1>, vector<8x8xf32>
    %cst_3 = arith.constant dense<0xFF800000> : vector<8xf32>
    %6 = vector.multi_reduction <maximumf>, %5, %cst_3 [1] : vector<8x8xf32> to vector<8xf32>
    %7 = vector.shape_cast %6 : vector<8xf32> to vector<8x1xf32>
    %8 = vector.broadcast %7 : vector<8x1xf32> to vector<8x8xf32>
    %9 = arith.subf %5, %8 : vector<8x8xf32>
    %10 = math.exp %9 : vector<8x8xf32>
    %cst_4 = arith.constant dense<0.000000e+00> : vector<8xf32>
    %11 = vector.multi_reduction <add>, %10, %cst_4 [1] : vector<8x8xf32> to vector<8xf32>
    %12 = vector.shape_cast %11 : vector<8xf32> to vector<8x1xf32>
    %13 = tpu.reciprocal %12 {approx = true} : vector<8x1xf32> -> vector<8x1xf32>
    %14 = vector.broadcast %13 : vector<8x1xf32> to vector<8x8xf32>
    %15 = arith.mulf %10, %14 : vector<8x8xf32>
    %16 = arith.truncf %15 : vector<8x8xf32> to vector<8x8xbf16>
    %c0_5 = arith.constant 0 : index
    %c0_6 = arith.constant 0 : index
    %c0_7 = arith.constant 0 : index
    %17 = vector.load %arg3[%c0_5, %c0_6, %c0_7] : memref<1x8x128xbf16, #tpu.memory_space<vmem>>, vector<1x8x128xbf16>
    %18 = vector.shape_cast %17 : vector<1x8x128xbf16> to vector<8x128xbf16>
    %cst_8 = arith.constant dense<0.000000e+00> : vector<8x128xf32>
    %19 = tpu.matmul %16, %18, %cst_8 {dimension_numbers = #tpu.dot_dimension_numbers<[1], [0], [0], [1], [0, 0, 1, 1], [], []>} : vector<8x8xbf16>, vector<8x128xbf16>, vector<8x128xf32> -> vector<8x128xf32>
    %20 = arith.truncf %19 : vector<8x128xf32> to vector<8x128xbf16>
    %c0_9 = arith.constant 0 : index
    %c0_10 = arith.constant 0 : index
    %21 = vector.load %arg4[%c0_9, %c0_10] : memref<128x128xbf16, #tpu.memory_space<vmem>>, vector<128x128xbf16>
    %cst_11 = arith.constant dense<0.000000e+00> : vector<8x128xf32>
    %22 = tpu.matmul %20, %21, %cst_11 {dimension_numbers = #tpu.dot_dimension_numbers<[1], [0], [0], [1], [0, 0, 1, 1], [], []>} : vector<8x128xbf16>, vector<128x128xbf16>, vector<8x128xf32> -> vector<8x128xf32>
    %c0_12 = arith.constant 0 : index
    %c0_13 = arith.constant 0 : index
    %23 = vector.load %arg5[%c0_12, %c0_13] : memref<1x128xf32, #tpu.memory_space<vmem>>, vector<1x128xf32>
    %24 = vector.broadcast %23 : vector<1x128xf32> to vector<8x128xf32>
    %25 = arith.addf %22, %24 : vector<8x128xf32>
    %c0_14 = arith.constant 0 : index
    %c0_15 = arith.constant 0 : index
    %c0_16 = arith.constant 0 : index
    %26 = vector.load %arg6[%c0_14, %c0_15, %c0_16] : memref<1x8x128xf32, #tpu.memory_space<vmem>>, vector<1x8x128xf32>
    %27 = vector.shape_cast %26 : vector<1x8x128xf32> to vector<8x128xf32>
    %28 = vector.shape_cast %25 : vector<8x128xf32> to vector<1x8x128xf32>
    tpu.vector_store %arg6[%c0_14, %c0_15, %c0_16], %28 {strides = array<i32>} : memref<1x8x128xf32, #tpu.memory_space<vmem>>, vector<1x8x128xf32>,
    return
  }
  func.func @transform_0(%arg0: i32, %arg1: i32) -> (i32, i32, i32) {
    %c0_i32 = arith.constant 0 : i32
    %c0_i32_0 = arith.constant 0 : i32
    return %arg0, %arg1, %c0_i32 : i32, i32, i32
  }
  func.func @transform_1(%arg0: i32, %arg1: i32) -> (i32, i32, i32) {
    %c0_i32 = arith.constant 0 : i32
    %c0_i32_0 = arith.constant 0 : i32
    %c0_i32_1 = arith.constant 0 : i32
    return %arg0, %c0_i32, %c0_i32_0 : i32, i32, i32
  }
  func.func @transform_2(%arg0: i32, %arg1: i32) -> (i32, i32) {
    %c0_i32 = arith.constant 0 : i32
    %c0_i32_0 = arith.constant 0 : i32
    %c0_i32_1 = arith.constant 0 : i32
    return %c0_i32, %c0_i32_0 : i32, i32
  }
  func.func @transform_3(%arg0: i32, %arg1: i32) -> (i32, i32) {
    %c0_i32 = arith.constant 0 : i32
    %c0_i32_0 = arith.constant 0 : i32
    %c0_i32_1 = arith.constant 0 : i32
    return %c0_i32, %c0_i32_0 : i32, i32
  }
  func.func @transform_4(%arg0: i32, %arg1: i32) -> (i32, i32, i32) {
    %c0_i32 = arith.constant 0 : i32
    %c0_i32_0 = arith.constant 0 : i32
    return %arg0, %arg1, %c0_i32 : i32, i32, i32
  }
}

</mosaic_0001>

<bundles_post_ra>
// kernel: tpu_custom_call.1
= control target key start
LH: loop header
LB: loop body
LE: loop exit
PB: predicated region body
PF: predicated region fallthrough
CT: control target
= control target key end

     0   :  { %9 = vsyncpa [#allocation3], 0  ;;  %s1136_s0 = inlined_call_operand.hbm [shape: f32[2,8,8], index: 0, kind: input, shape index: {}]   ;;  %s1137_s1 = inlined_call_operand.hbm [shape: bf16[2,8,128], index: 1, kind: input, shape index: {}]   ;;  %s1138_s2 = inlined_call_operand.hbm [shape: bf16[128,128], index: 2, kind: input, shape index: {}]   ;;  %s1139_s3 = inlined_call_operand.vmem [shape: f32[1,128], index: 3, kind: input, shape index: {}]   ;;  %s1140_s4 = inlined_call_operand.hbm [shape: f32[2,8,128], index: 4, kind: output, shape index: {}]  }
   0x1   :  { %11 = vsyncpa [#allocation3 + $0x1], 0 }
   0x2   :  { %12 = vsyncpa [#allocation6], 0 }
   0x3   :  { %13 = vsyncpa [#allocation4], 0 }
   0x4   :  { %15 = vsyncpa [#allocation4 + $0x1], 0  ;;  %s921_s15 = smov 0   ;;  %s923_s16 = smov 0  }
   0x5   :  { %s925_s17 = smov 0   ;;  %s927_s18 = smov 0  }
   0x6   :  { %s929_s19 = smov 0   ;;  %s931_s20 = smov 0  }
   0x7 LB: > { %s558_s21 = sadd.s32 4294967295, %s886_s20   ;;  %s559_s22 = sadd.s32 4294967294, %s886_s20   ;;  %s886_s20 = sphi %s931_s20, %s21_s20   ;;  %s882_s19 = sphi %s929_s19, %s1167_s19   ;;  %s878_s18 = sphi %s927_s18, %s1166_s18   ;;  %s874_s17 = sphi %s925_s17, %s1165_s17   ;;  %s870_s16 = sphi %s923_s16, %s1164_s16   ;;  %s866_s15 = sphi %s921_s15, %s1163_s15  }
   0x8   : > { %p55_p0 = scmp.ne.s32.totalorder %s870_s16, %s866_s15  ;;  %p955_p1 = scmp.eq.s32.totalorder %s558_s21, 0 }
   0x9   : > { %p959_p2 = scmp.eq.s32.totalorder %s558_s21, 1  ;;  %p155_p3 = scmp.eq.s32.totalorder %s559_s22, 1 }
   0xa   : > { %s1147_s23 = scalar_select %p955_p1, 1, 0 }
   0xb   : > { %s1148_s24 = scalar_select %p959_p2, 1, 0 }
   0xc   : > { %p965_p4 = por %p955_p1, %p55_p0  ;;  %p560_p5 = scmp.ge.s32.totalorder %s886_s20, 1 }
   0xd   : > { %p970_p6 = por %p155_p3, %p55_p0  ;;  %p162_p7 = scmp.lt.s32.totalorder %s886_s20, 3 }
   0xe   : > { %s1149_s25 = scalar_select %p965_p4, 1, 0 }
   0xf   : > { %s1150_s26 = scalar_select %p970_p6, 1, 0 }
  0x10   : > { %s561_s27 = sshll.u32 %s878_s18, 6  ;;  %p976_p8 = pnand %p560_p5, %p162_p7 }
  0x11   : > { %s983_s5 = scalar_lea.hbm %s1137_s1, %s561_s27  ;;  %s888_s6 = smov [#allocation5]  }
  0x12   : > { %s1151_s28 = scalar_select %p976_p8, 1, 0 }
  0x13   : > { %s177_s7 = sshll.u32 %s888_s6, 4  ;;  %p631_p9 = pneg %p976_p8  ;;  %s178_s7 = int_to_ptr.vmem [resolvable:$true] %s177_s7 }
  0x14   : > { %s889_s10 = smov [#allocation7]   ;;  %s716_s12 = scalar_lea.hbm %s983_s5, 64 }
  0x15   : > { %p990_p11 = pnand %p631_p9, %p965_p4  ;;  %p996_p12 = pnand %p631_p9, %p955_p1 }
  0x16   : > { %s187_s11 = sshll.u32 %s889_s10, 4  ;;  %p717_p13 = scmp.ne.s32.totalorder %s983_s5, %s716_s12  ;;  %s188_s11 = int_to_ptr.vmem [resolvable:$true] %s187_s11 }
  0x17   : > { %s1153_s9 = scalar_select %p996_p12, 1, 0 }
  0x18   : > { %p718_p0 = pneg %p990_p11  ;;  %s721_s21 = scalar_lea.hbm %s1137_s1, 128 }
  0x19   : > { %p722_p7 = scmp.lt.s32.totalorder %s983_s5, %s1137_s1  ;;  %p723_p9 = scmp.lt.s32.totalorder %s721_s21, %s716_s12 }
  0x1a   : > { %p719_p3 = pnand %p718_p0, %p717_p13 }
  0x1b   : > { %p724_p10 = por %p723_p9, %p722_p7 }
  0x1c   : > { %p720_p5 = pneg %p719_p3 }
  0x1e   : > { %p725_p6 = pnand %p724_p10, %p720_p5 }
  0x20   : > { %728 = shalt.err (!%p725_p6)
}
  0x21   : > { %s729_s29 = scalar_lea.vmem %s178_s7, 64  ;;  %p737_p2 = scmp.lt.s32.totalorder %s178_s7, %s178_s7 }
  0x22   : > { %p730_p1 = scmp.ne.s32.totalorder %s178_s7, %s729_s29  ;;  %p738_p12 = scmp.lt.s32.totalorder %s729_s29, %s729_s29 }
  0x24   : > { %p732_p4 = pnand %p730_p1, %p718_p0  ;;  %p739_p13 = por %p738_p12, %p737_p2 }
  0x26   : > { %p733_p8 = pneg %p732_p4 }
  0x28   : > { %p740_p3 = pnand %p739_p13, %p733_p8 }
  0x2a   : > { %743 = shalt.err (!%p740_p3)
}
  0x2b   : > { %634 = dma.hbm_to_vmem [thread:$0]  (!%p990_p11), %s983_s5, 64, %s178_s7, [#allocation6]  }
  0x2c   : > { %p1154_p7 = scmp.ne.s32.totalorder %s1153_s9, 0  ;;  %s755_s30 = scalar_lea.vmem %s188_s11, 1024 }
  0x2d   : > { %p756_p10 = scmp.ne.s32.totalorder %s188_s11, %s755_s30  ;;  %p763_p0 = scmp.lt.s32.totalorder %s188_s11, %s188_s11 }
  0x2e   : > { %p746_p9 = pneg %p1154_p7  ;;  %p764_p1 = scmp.lt.s32.totalorder %s755_s30, %s755_s30 }
  0x30   : > { %p758_p6 = pnand %p756_p10, %p746_p9  ;;  %p765_p4 = por %p764_p1, %p763_p0 }
  0x32   : > { %p759_p5 = pneg %p758_p6 }
  0x34   : > { %p766_p2 = pnand %p765_p4, %p759_p5 }
  0x36   : > { %769 = shalt.err (!%p766_p2)
}
  0x37   : > { %s890_s6 = smov 64   ;;  %s891_s5 = smov 4  }
  0x38   : > { %637 = dma.hbm_to_vmem [thread:$0]  (!%p1154_p7), %s1138_s2, 1024, %s188_s11, [#allocation6], %s890_s6, %s890_s6, %s891_s5  }
  0x39   : > { %s33_s10 = sadd.s32 1, %s882_s19  ;;  %s42_s12 = sadd.s32 1, %s874_s17 }
  0x3a   : > { %p35_p8 = scmp.ge.s32.totalorder %s33_s10, 2  ;;  %p49_p11 = scmp.ne.s32.totalorder %s874_s17, %s870_s16 }
  0x3b   : > { %p50_p12 = scmp.eq.s32.totalorder %s886_s20, 0  ;;  %p647_p13 = scmp.lt.s32.totalorder %s886_s20, 2 }
  0x3c   : > { %s1169_s10 = smov (%p35_p8, %s33_s10), 0  ;;  %p1155_p9 = scmp.ne.s32.totalorder %s1148_s24, 0 }
  0x3d   : > { %p51_p3 = por %p50_p12, %p49_p11  ;;  %s37_s9 = ssub.s32 %s882_s19, %s1169_s10 }
  0x3e   : > { %p1031_p10 = por %p1155_p9, %p49_p11  ;;  %s204_s14 = sand.u32 1, %s874_s17  }
  0x3f   : > { %p40_p6 = scmp.eq.s32.totalorder %s37_s9, 0  ;;  %s564_s11 = sshll.u32 %s204_s14, 3 }
  0x40   : > { %s565_s21 = sshll.u32 %s882_s19, 7  ;;  %s208_s6 = scalar_lea.vmem [#allocation2], %s564_s11 }
  0x41   : > { %s1040_s22 = scalar_select %p40_p6, %s874_s17, %s42_s12  }
  0x42   : > { %s214_s30 = scalar_lea.hbm %s1136_s0, %s565_s21  ;;  %s216_s5 = sshll.u32 %s208_s6, 4  ;;  %s217_s5 = int_to_ptr.vmem [resolvable:$true] %s216_s5 }
  0x43   : > { %p1047_p7 = pnand %p647_p13, %p51_p3  ;;  %s205_s7 = scalar_lea.sflag [#allocation3], %s204_s14 }
  0x44   : > { %s783_s8 = scalar_lea.vmem %s217_s5, 128  ;;  %s892_s12 = smov [#allocation2]  }
  0x45   : > { %p772_p5 = pneg %p1047_p7  ;;  %p784_p0 = scmp.ne.s32.totalorder %s217_s5, %s783_s8 }
  0x46   : > { %s788_s9 = sshll.u32 %s892_s12, 4  ;;  %s789_s9 = int_to_ptr.vmem [resolvable:$false] %s788_s9 }
  0x47   : > { %p786_p1 = pnand %p784_p0, %p772_p5  ;;  %s790_s21 = scalar_lea.vmem %s789_s9, 256 }
  0x48   : > { %p791_p2 = scmp.lt.s32.totalorder %s217_s5, %s789_s9  ;;  %p792_p8 = scmp.lt.s32.totalorder %s790_s21, %s783_s8 }
  0x49   : > { %p787_p4 = pneg %p786_p1 }
  0x4a   : > { %p793_p11 = por %p792_p8, %p791_p2 }
  0x4c   : > { %p794_p12 = pnand %p793_p11, %p787_p4 }
  0x4e   : > { %797 = shalt.err (!%p794_p12)
}
  0x4f   : > { %641 = dma.hbm_to_vmem [thread:$0]  (!%p1047_p7), %s214_s30, 128, %s217_s5, %s205_s7  }
  0x50   : > { %p1158_p13 = scmp.ne.s32.totalorder %s1151_s28, 0 }
  0x51   : > { %s1058_s14 = sand.u32 (!%p1158_p13), 1, %s870_s16   ;;  %p1159_p3 = scmp.ne.s32.totalorder (!%p1158_p13), %s1149_s25, 0 }
  0x52   : > { %225 = sbr.rel (%p1158_p13) target bundleno = 814 (0x32e), region = 36  ;;  %s567_s11 = sshll.u32 (!%p1158_p13), %s1058_s14, 3 }
  0x53   : > { %s228_s27 = scalar_lea.sflag (!%p1158_p13), [#allocation3], %s1058_s14  ;;  %s231_s29 = scalar_lea.vmem (!%p1158_p13), [#allocation2], %s567_s11 }
  0x57   : > { %849 = dma.done.wait (%p1159_p3), %s228_s27, 128  }
  0x58   : > { %851 = vsyncadd (%p1159_p3), %s228_s27, 4294967168 }
  0x59   : > { %853 = dma.done.wait (%p1159_p3), [#allocation6], 64  }
  0x5a   : > { %855 = vsyncadd (%p1159_p3), [#allocation6], 4294967232  ;;  %p1160_p9 = scmp.ne.s32.totalorder %s1147_s23, 0 }
  0x5c   : > { %857 = dma.done.wait (%p1160_p9), [#allocation6], 1024  }
  0x5d   : > { %859 = vsyncadd (%p1160_p9), [#allocation6], 4294966272  ;;  %v265_v0 = vld [vmem:[%s231_s29] sm:$0xff]  ;;  %vm268_vm0 = vcmask 64512   ;;  %v281_v8 = vld [vmem:[#allocation5] sm:$0xf] }
  0x5e   : > { %vm266_vm1 = vcmp.eq.f32.partialorder %v265_v0, 0.0  ;;  %vm285_vm2 = vcmask 1043456   ;;  %v893_v9 = vmov 0.0   ;;  %vm894_vm3 = vmmov 0   ;;  %v704_v11 = vld [vmem:[#allocation7 + $0x38] sm:$0xff]   ;;  %v705_v12 = vld [vmem:[#allocation7 + $0x30] sm:$0xff]  }
  0x5f   : > { %v267_v1 = vsel %vm266_vm1, -1e+30, %v265_v0  ;;  %595 = vmatprep.subr.bf16.mxu0 %v893_v9  ;;  %v287_v10 = vsel %vm285_vm2, %v281_v8, 0  ;;  %597 = vmatprep.mubr.msk.bf16.mxu0 %vm894_vm3, %v893_v9  ;;  %v706_v13 = vld [vmem:[#allocation7 + $0x28] sm:$0xff]   ;;  %v707_v14 = vld [vmem:[#allocation7 + $0x20] sm:$0xff]   ;;  %v708_v15 = vld [vmem:[#allocation7 + $0x18] sm:$0xff]  }
  0x60   : > { %v269_v2 = vsel %vm268_vm0, %v267_v1, -inf  ;;  %596 = vmatpush3.bf16.msra.mxu0 %v287_v10  ;;  %601 = vmatprep.subr.bf16.mxu1 %v893_v9  ;;  %v709_v16 = vld [vmem:[#allocation7 + $0x10] sm:$0xff]   ;;  %v710_v17 = vld [vmem:[#allocation7 + $0x8] sm:$0xff]   ;;  %v711_v22 = vld [vmem:[#allocation7] sm:$0xff]   ;;  %s581_s28 = sshll.u32 %s878_s18, 7  ;;  %s263_s30 = scalar_lea.vmem [#allocation8], %s567_s11 }
  0x61   : > { %270 = vmax.xlane.f32.xlu0 %v269_v2  ;;  %617 = vmatprep.mubr.msk.bf16.mxu1 %vm894_vm3, %v893_v9  ;;  %v571_v28 = vld [vmem:[%s1139_s3] ss:$0 sm:$0xff]  ;;  %s457_s6 = sshll.u32 %s263_s30, 4  ;;  %s1088_s7 = scalar_lea.hbm %s1140_s4, %s581_s28  ;;  %s1090_s6 = int_to_ptr.vmem [resolvable:$true] %s457_s6 }
  0x62   : > { %602 = vmatpush3.bf16.msra.mxu1 %v704_v11  ;;  %s443_s8 = scalar_lea.sflag [#allocation4], %s1058_s14  ;;  %s798_s18 = scalar_lea.vmem %s1090_s6, 128 }
  0x63   : > { %603 = vmatprep.subr.bf16.mxu1 %v893_v9  ;;  %p799_p6 = scmp.ne.s32.totalorder %s1090_s6, %s798_s18  ;;  %s895_s12 = smov [#allocation8]  }
  0x64   : > { %s802_s9 = sshll.u32 %s895_s12, 4  ;;  %s803_s9 = int_to_ptr.vmem [resolvable:$false] %s802_s9 }
  0x65   : > { %p800_p7 = pnand %p799_p6, %p1031_p10  ;;  %s804_s21 = scalar_lea.vmem %s803_s9, 256 }
  0x66   : > { %604 = vmatpush3.bf16.msra.mxu1 %v705_v12  ;;  %p805_p0 = scmp.lt.s32.totalorder %s1090_s6, %s803_s9  ;;  %p806_p1 = scmp.lt.s32.totalorder %s804_s21, %s798_s18 }
  0x67   : > { %605 = vmatprep.subr.bf16.mxu1 %v893_v9  ;;  %p801_p5 = pneg %p800_p7 }
  0x68   : > { %p807_p4 = por %p806_p1, %p805_p0 }
  0x6a   : > { %606 = vmatpush3.bf16.msra.mxu1 %v706_v13  ;;  %p808_p2 = pnand %p807_p4, %p801_p5 }
  0x6b   : > { %607 = vmatprep.subr.bf16.mxu1 %v893_v9 }
  0x6e   : > { %608 = vmatpush3.bf16.msra.mxu1 %v707_v14 }
  0x6f   : > { %609 = vmatprep.subr.bf16.mxu1 %v893_v9 }
  0x72   : > { %610 = vmatpush3.bf16.msra.mxu1 %v708_v15 }
  0x73   : > { %611 = vmatprep.subr.bf16.mxu1 %v893_v9 }
  0x76   : > { %612 = vmatpush3.bf16.msra.mxu1 %v709_v16 }
  0x77   : > { %613 = vmatprep.subr.bf16.mxu1 %v893_v9 }
  0x7a   : > { %614 = vmatpush3.bf16.msra.mxu1 %v710_v17 }
  0x7b   : > { %615 = vmatprep.subr.bf16.mxu1 %v893_v9 }
  0x7e   : > { %616 = vmatpush3.bf16.msra.mxu1 %v711_v22 }
  0xea   : > { %v271_v3 = vpop.xlane.xlu0 %270 }
  0xeb   : > { %v272_v4 = vsub.f32 %v267_v1, %v271_v3 }
  0xed   : > { %v273_v5 = vmul.f32 1.442695, %v272_v4 }
  0xef   : > { %712 = vpow2.f32 %v273_v5 }
  0xfc   : > { %v713_v6 = vpop.eup %712 }
  0xfd   : > { %v275_v7 = vsel %vm268_vm0, %v713_v6, 0.0 }
  0xfe   : > { %276 = vadd.xlane.f32.xlu0 %v275_v7 }
 0x187   : > { %v277_v18 = vpop.xlane.xlu0 %276 }
 0x188   : > { %714 = vrcp.f32 %v277_v18 }
 0x195   : > { %v715_v19 = vpop.eup %714 }
 0x196   : > { %v279_v20 = vmul.f32 %v715_v19, %v713_v6 }
 0x198   : > { %v280_v21 = vpack.c.bf16 %v279_v20, %v279_v20 }
 0x19a   : > { %598 = vmatmul.mubr.msk.bf16.vlgmr.msra.gmra.mxu0 %vm268_vm0, %v280_v21 }
 0x25a   : > { %v323_v23 = vpop.f32.mrf.mxu0 }
 0x25b   : > { %v329_v24 = vpack.c.bf16 %v323_v23, %v323_v23 }
 0x25c   : > { %v599_v25 = vpop.f32.mrf.mxu0 }
 0x25d   : > { %618 = vmatmul.mubr.bf16.vlgmr.msra.gmra.mxu1 %v329_v24 }
 0x25e   : > { %v326_v26 = vpop.f32.mrf.mxu0 }
 0x260   : > { %v600_v27 = vpop.f32.mrf.mxu0 }
 0x31d   : > { %v435_v29 = vpop.f32.mrf.mxu1 }
 0x31e   : > { %v436_v30 = vadd.f32 %v571_v28, %v435_v29 }
 0x31f   : > { %v619_v31 = vpop.f32.mrf.mxu1 }
 0x320   : > { %441 = vst [vmem:[%s263_s30] sm:$0xff] %v436_v30 }
 0x321   : > { %v438_v32 = vpop.f32.mrf.mxu1 }
 0x322   : > { %811 = shalt.err (!%p808_p2)
}
 0x323   : > { %s812_s11 = scalar_lea.hbm %s1088_s7, 128  ;;  %s816_s29 = scalar_lea.hbm %s1140_s4, 256 }
 0x324   : > { %p813_p8 = scmp.ne.s32.totalorder %s1088_s7, %s812_s11  ;;  %p817_p13 = scmp.lt.s32.totalorder %s1088_s7, %s1140_s4 }
 0x325   : > { %p818_p3 = scmp.lt.s32.totalorder %s816_s29, %s812_s11 }
 0x326   : > { %p814_p11 = pnand %p813_p8, %p1031_p10 }
 0x327   : > { %p819_p9 = por %p818_p3, %p817_p13 }
 0x328   : > { %p815_p12 = pneg %p814_p11 }
 0x32a   : > { %p820_p6 = pnand %p819_p9, %p815_p12 }
 0x32c   : > { %823 = shalt.err (!%p820_p6)
}
 0x32d   : > { %629 = dma.vmem_to_hbm [thread:$0]  (%p1031_p10), %s1090_s6, 128, %s1088_s7, %s443_s8   ;;  %v620_v33 = vpop.f32.mrf.mxu1 }
 0x32e PF: > { %s469_s28 = sand.u32 1, %s866_s15   ;;  %p1161_p7 = scmp.ne.s32.totalorder %s1150_s26, 0 }
 0x32f   : > { %p1162_p5 = scmp.ge.s32.totalorder %s886_s20, 2  ;;  %s470_s30 = scalar_lea.sflag [#allocation4], %s469_s28 }
 0x331   : > { %p643_p0 = pnand %p1162_p5, %p1161_p7 }
 0x333   : > { %p644_p1 = pneg %p643_p0 }
 0x335   : > { %861 = dma.done.wait (%p644_p1), %s470_s30, 128  }
 0x336   : > { %863 = vsyncadd (%p644_p1), %s470_s30, 4294967168  ;;  %s21_s20 = sadd.s32 1, %s886_s20   ;;  %s1163_s15 = smov %s870_s16 }
 0x337   : > { %p18_p4 = scmp.ge.s32.totalorder %s21_s20, 4   ;;  %s1164_s16 = smov %s874_s17 }
 0x338   : > { %s1165_s17 = smov %s1040_s22  ;;  %s1166_s18 = smov %s882_s19 }
 0x339   : > { %s1167_s19 = smov %s1169_s10  ;;  %20 = sbr.rel (!%p18_p4) target bundleno = 7 (0x7), region = 90 }
 0x33e   :  { %475 = vsyncpa [#allocation3], 1 }
 0x33f   :  { %477 = vsyncpa [#allocation3 + $0x1], 1 }
 0x340   :  { %478 = vsyncpa [#allocation6], 1 }
 0x341   :  { %479 = vsyncpa [#allocation4], 1 }
 0x342   :  { %481 = vsyncpa [#allocation4 + $0x1], 1 }

</bundles_post_ra>
